<compile_context>
chip_gen: v7x
topology: tpu7x:2x2x1
jax: 0.10.0
libtpu: 0.0.40
codegen_flags: <defaults>
</compile_context>

<pallas_src>
import functools

import jax
import jax.numpy as jnp
from jax import lax
from jax.experimental import pallas as pl
from jax.experimental.pallas import tpu as pltpu

IN1 = 30   # features contributed by x1
IN2 = 30   # features contributed by x2
IN = IN1 + IN2
OUT = 30   # out_features


def fc_kernel(x1_ref, x2_ref, w_ref, b_ref, o_ref):
    # x1_ref: [TB, IN1], x2_ref: [TB, IN2], w_ref: [OUT, IN] (PyTorch layout, unsliced),
    # b_ref: [1, OUT], o_ref: [TB, OUT]
    x1 = x1_ref[...].astype(jnp.float32)            # cast fused into the kernel (VMEM-only)
    x2 = x2_ref[...].astype(jnp.float32)

    # torch.hstack fused in-kernel: one lane-axis concat -> single K=60 matmul.
    # Cheaper than two K=30 matmuls (each padded to K=128 on the MXU) + a VPU add,
    # and it avoids any per-step, non-128-aligned slice of the resident weight.
    x = jnp.concatenate([x1, x2], axis=-1)          # [TB, IN]

    w = w_ref[...].astype(jnp.float32)              # [OUT, IN], never transposed in HBM
    b = b_ref[...].astype(jnp.float32)              # [1, OUT]

    # x @ W.T expressed by contracting the in-feature axes directly (rhs untransposed).
    dn = (((1,), (1,)), ((), ()))
    acc = lax.dot_general(x, w, dn, preferred_element_type=jnp.float32)

    o_ref[...] = acc + b                            # single VPU broadcast-add per tile
    # TODO(synk): OUT=30 (<128 lanes) still writes via masked vst stores; a lane-dense
    # [OUT, B] output layout would remove them, but the module contract is [B, OUT] and
    # a wrapper-side transpose back would cost an extra HBM pass, negating the win.


@functools.partial(jax.jit, static_argnames=("block_b",))
def fully_connected(x1, x2, weight, bias, *, block_b=8192):
    """Equivalent of: nn.Linear(60, 30)(torch.hstack([x1, x2]).float()).squeeze()

    x1, x2: [B, 30] (any float dtype; cast to f32 in VMEM).
    weight: [30, 60] (PyTorch layout).  bias: [30].
    """
    B, f1 = x1.shape
    _, f2 = x2.shape
    out_f, in_f = weight.shape

    b2d = bias.reshape(1, out_f)                    # metadata-only reshape (120 B)

    # Batch tile: whole batch if small, else a big multiple-of-8 tile (8192) so each
    # grid step's HBM traffic dwarfs the ~0.35 us fixed step cost.  At tb=8192 (f32) the
    # double-buffered inputs+output are ~6 MB, safe against v7x's 64 MiB VMEM (32 MiB
    # scoped budget below) and trivially so on v5e/v6e (128 MiB).
    tb = B if B <= block_b else block_b
    grid = (pl.cdiv(B, tb),)

    out = pl.pallas_call(
        fc_kernel,
        out_shape=jax.ShapeDtypeStruct((B, out_f), jnp.float32),
        grid=grid,
        in_specs=[
            pl.BlockSpec((tb, f1), lambda i: (i, 0)),
            pl.BlockSpec((tb, f2), lambda i: (i, 0)),
            pl.BlockSpec((out_f, in_f), lambda i: (0, 0)),   # weight resident across steps
            pl.BlockSpec((1, out_f), lambda i: (0, 0)),      # bias resident across steps
        ],
        out_specs=pl.BlockSpec((tb, out_f), lambda i: (i, 0)),
        compiler_params=pltpu.CompilerParams(
            # "parallel" lets the batch-tile axis shard across v7x's 2 TensorCores;
            # if a profile ever shows one TC idle, switch to pltpu.CORE_PARALLEL.
            dimension_semantics=("parallel",),
            vmem_limit_bytes=32 * 1024 * 1024,
        ),
    )(x1, x2, weight, b2d)

    # Match torch's .squeeze() (drops all size-1 dims, e.g. the batch dim when B == 1).
    return jnp.squeeze(out)


if __name__ == "__main__":
    key = jax.random.PRNGKey(0)
    k1, k2, kw, kb = jax.random.split(key, 4)

    B = 2
    # Each input contributes 30 features; hstack -> 60 = Linear in_features.
    x1 = jax.random.normal(k1, (B, 30), dtype=jnp.float32)
    x2 = jax.random.normal(k2, (B, 30), dtype=jnp.float32)

    # Deterministic nn.Linear-style init: U(-1/sqrt(60), 1/sqrt(60)).
    bound = 1.0 / jnp.sqrt(60.0)
    weight = jax.random.uniform(kw, (30, 60), minval=-bound, maxval=bound,
                                dtype=jnp.float32)
    bias = jax.random.uniform(kb, (30,), minval=-bound, maxval=bound,
                              dtype=jnp.float32)

    out = fully_connected(x1, x2, weight, bias)
    out = jax.block_until_ready(out)

    # Reference check in plain JAX (matches the torch forward).
    ref = jnp.squeeze(
        jnp.concatenate([x1, x2], axis=1).astype(jnp.float32) @ weight.T + bias)
    assert out.shape == ref.shape == (B, 30)
    assert jnp.allclose(out, ref, atol=1e-5, rtol=1e-5)

    print("KERNEL_OK")
</pallas_src>

<mosaic_0001>
module attributes {stable_mosaic.version = 11 : i64} {
  func.func @fc_kernel(%arg0: i32, %arg1: memref<2x30xf32, #tpu.memory_space<vmem>>, %arg2: memref<2x30xf32, #tpu.memory_space<vmem>>, %arg3: memref<30x60xf32, #tpu.memory_space<vmem>>, %arg4: memref<1x30xf32, #tpu.memory_space<vmem>>, %arg5: memref<2x30xf32, #tpu.memory_space<vmem>>) attributes {dimension_semantics = [#tpu.dimension_semantics<parallel>], iteration_bounds = array<i64: 1>, scalar_prefetch = 0 : i64, scratch_operands = 0 : i64, tpu.core_type = #tpu.core_type<tc>, window_params = [{transform_indices = @transform_0, window_bounds = array<i64: 2, 30>}, {transform_indices = @transform_1, window_bounds = array<i64: 2, 30>}, {pipeline_mode = #tpu.pipeline_mode<synchronous>, transform_indices = @transform_2, window_bounds = array<i64: 30, 60>}, {pipeline_mode = #tpu.pipeline_mode<synchronous>, transform_indices = @transform_3, window_bounds = array<i64: 1, 30>}, {transform_indices = @transform_4, window_bounds = array<i64: 2, 30>}]} {
    %c0 = arith.constant 0 : index
    %c0_0 = arith.constant 0 : index
    %0 = vector.load %arg1[%c0, %c0_0] : memref<2x30xf32, #tpu.memory_space<vmem>>, vector<2x30xf32>
    %c0_1 = arith.constant 0 : index
    %c0_2 = arith.constant 0 : index
    %1 = vector.load %arg2[%c0_1, %c0_2] : memref<2x30xf32, #tpu.memory_space<vmem>>, vector<2x30xf32>
    %2 = tpu.concatenate %0, %1 in 1 : vector<2x30xf32>, vector<2x30xf32> -> vector<2x60xf32>
    %c0_3 = arith.constant 0 : index
    %c0_4 = arith.constant 0 : index
    %3 = vector.load %arg3[%c0_3, %c0_4] : memref<30x60xf32, #tpu.memory_space<vmem>>, vector<30x60xf32>
    %c0_5 = arith.constant 0 : index
    %c0_6 = arith.constant 0 : index
    %4 = vector.load %arg4[%c0_5, %c0_6] : memref<1x30xf32, #tpu.memory_space<vmem>>, vector<1x30xf32>
    %cst = arith.constant dense<0.000000e+00> : vector<2x30xf32>
    %5 = tpu.matmul %2, %3, %cst {dimension_numbers = #tpu.dot_dimension_numbers<[1], [1], [0], [0], [0, 0, 1, 0], [], []>} : vector<2x60xf32>, vector<30x60xf32>, vector<2x30xf32> -> vector<2x30xf32>
    %6 = vector.broadcast %4 : vector<1x30xf32> to vector<2x30xf32>
    %7 = arith.addf %5, %6 : vector<2x30xf32>
    %c0_7 = arith.constant 0 : index
    %c0_8 = arith.constant 0 : index
    %8 = vector.load %arg5[%c0_7, %c0_8] : memref<2x30xf32, #tpu.memory_space<vmem>>, vector<2x30xf32>
    tpu.vector_store %arg5[%c0_7, %c0_8], %7 {strides = array<i32>} : memref<2x30xf32, #tpu.memory_space<vmem>>, vector<2x30xf32>,
    return
  }
  func.func @transform_0(%arg0: i32) -> (i32, i32) {
    %c0_i32 = arith.constant 0 : i32
    %c0_i32_0 = arith.constant 0 : i32
    return %arg0, %c0_i32 : i32, i32
  }
  func.func @transform_1(%arg0: i32) -> (i32, i32) {
    %c0_i32 = arith.constant 0 : i32
    %c0_i32_0 = arith.constant 0 : i32
    return %arg0, %c0_i32 : i32, i32
  }
  func.func @transform_2(%arg0: i32) -> (i32, i32) {
    %c0_i32 = arith.constant 0 : i32
    %c0_i32_0 = arith.constant 0 : i32
    %c0_i32_1 = arith.constant 0 : i32
    return %c0_i32, %c0_i32_0 : i32, i32
  }
  func.func @transform_3(%arg0: i32) -> (i32, i32) {
    %c0_i32 = arith.constant 0 : i32
    %c0_i32_0 = arith.constant 0 : i32
    %c0_i32_1 = arith.constant 0 : i32
    return %c0_i32, %c0_i32_0 : i32, i32
  }
  func.func @transform_4(%arg0: i32) -> (i32, i32) {
    %c0_i32 = arith.constant 0 : i32
    %c0_i32_0 = arith.constant 0 : i32
    return %arg0, %c0_i32 : i32, i32
  }
}

</mosaic_0001>

<bundles_post_ra>
// kernel: fully_connected.1
= control target key start
LH: loop header
LB: loop body
LE: loop exit
PB: predicated region body
PF: predicated region fallthrough
CT: control target
= control target key end

     0   :  { %9 = vsyncpa [#allocation3], 0  ;;  %s309_s0 = inlined_call_operand.vmem [shape: f32[2,30], index: 0, kind: input, shape index: {}]   ;;  %s310_s1 = inlined_call_operand.vmem [shape: f32[2,30], index: 1, kind: input, shape index: {}]   ;;  %s311_s2 = inlined_call_operand.hbm [shape: f32[30,60], index: 2, kind: input, shape index: {}]   ;;  %s312_s3 = inlined_call_operand.vmem [shape: f32[1,30], index: 3, kind: input, shape index: {}]   ;;  %s313_s4 = inlined_call_operand.hbm [shape: f32[2,30], index: 4, kind: output, shape index: {}]  }
   0x1   :  { %10 = vsyncpa [#allocation4], 0  ;;  %s240_s15 = smov [#allocation2]   ;;  %s192_s19 = scalar_lea.hbm %s311_s2, 512 }
   0x2   :  { %s20_s16 = sshll.u32 %s240_s15, 4  ;;  %p193_p0 = scmp.ne.s32.totalorder %s311_s2, %s192_s19  ;;  %s21_s16 = int_to_ptr.vmem [resolvable:$true] %s20_s16 }
   0x3   :  { %p196_p1 = scmp.lt.u32.totalorder %s192_s19, %s311_s2 }
   0x5   :  { %p198_p2 = pnand %p196_p1, %p193_p0 }
   0x7   :  { %201 = shalt.err (!%p198_p2)
}
   0x8   :  { %s202_s24 = scalar_lea.vmem %s21_s16, 512  ;;  %p207_p4 = scmp.lt.s32.totalorder %s21_s16, %s21_s16 }
   0x9   :  { %p203_p3 = scmp.ne.s32.totalorder %s21_s16, %s202_s24  ;;  %p208_p5 = scmp.lt.s32.totalorder %s202_s24, %s202_s24 }
   0xb   :  { %p209_p6 = por %p208_p5, %p207_p4 }
   0xd   :  { %p210_p7 = pnand %p209_p6, %p203_p3 }
   0xf   :  { %213 = shalt.err (!%p210_p7)
}
  0x10   :  { %s241_s25 = smov 128   ;;  %s242_s26 = smov 8  }
  0x11   :  { %26 = dma.hbm_to_vmem [thread:$0]  %s311_s2, 512, %s21_s16, [#allocation3], %s241_s25, %s241_s25, %s242_s26  }
  0x12   :  { %236 = dma.done.wait [#allocation3], 512  }
  0x13   :  { %237 = vsyncadd [#allocation3], 4294966784  ;;  %v243_v0 = vmov 0.0|0.0   ;;  %vm244_vm0 = vmmov 0   ;;  %v245_v1 = vmov 0.0   ;;  %vm51_vm1 = vcmask 490496  }
  0x14   :  { %176 = vmatprep.subr.bf16.mxu0 %v243_v0  ;;  %173 = vmatprep.mubr.msk.f32.mxu0 %vm244_vm0, %v245_v1  ;;  %vm178_vm2 = vmpackc.low %vm51_vm1, %vm51_vm1  ;;  %v33_v2 = vld [vmem:[%s310_s1] sm:$0x3]  ;;  %v41_v4 = vld [vmem:[#allocation2 + $0x8] sm:$0xff]  ;;  %s246_s5 = smov 30   ;;  %vm38_vm3 = vcmask 244736   ;;  %s247_s8 = smov [#allocation5]  }
  0x15   :  { %v40_v3 = vld [vmem:[#allocation2] sm:$0xff]  ;;  %35 = vrot.lane.b32.xlu0 %v33_v2, %s246_s5  ;;  %v42_v6 = vld [vmem:[#allocation2 + $0x10] sm:$0xff]  ;;  %v43_v7 = vld [vmem:[#allocation2 + $0x18] sm:$0x3f]  ;;  %s145_s9 = sshll.u32 %s247_s8, 4  ;;  %vm137_vm4 = vcmask 238592   ;;  %s146_s9 = int_to_ptr.vmem [resolvable:$true] %s145_s9 }
  0x16   :  { %v177_v5 = vpack.c.bf16 %v41_v4, %v40_v3  ;;  %v181_v8 = vpack.c.bf16 %v43_v7, %v42_v6  ;;  %v32_v9 = vld [vmem:[%s309_s0] sm:$0x3]  ;;  %s214_s10 = scalar_lea.vmem %s146_s9, 32  ;;  %p219_p9 = scmp.lt.s32.totalorder %s146_s9, %s146_s9 }
  0x17   :  { %v154_v12 = vld [vmem:[%s312_s3] ss:$0 sm:$0xff]  ;;  %p215_p8 = scmp.ne.s32.totalorder %s146_s9, %s214_s10  ;;  %p220_p10 = scmp.lt.s32.totalorder %s214_s10, %s214_s10 }
  0x18   :  { %179 = vmatpush3.bf16.xpose.msk.msra.mxu0 %vm178_vm2, %v177_v5 }
  0x19   :  { %180 = vmatprep.subr.bf16.mxu0 %v243_v0  ;;  %p221_p11 = por %p220_p10, %p219_p9 }
  0x1b   :  { %p222_p12 = pnand %p221_p11, %p215_p8 }
  0x20   :  { %183 = vmatpush3.bf16.xpose.msk.msra.mxu0 %vm178_vm2, %v181_v8 }
  0x87   :  { %v36_v10 = vpop.permute.xlu0 %35 }
  0x88   :  { %v39_v11 = vsel %vm38_vm3, %v32_v9, %v36_v10 }
  0x89   :  { %174 = vmatmul.mubr.msk.f32.vlgmr.msra.gmra.mrb[0].mxu0 %vm51_vm1, %v39_v11 }
 0x15c   :  { %v133_v13 = vpop.f32.mrb[0].mxu0 }
 0x15d   :  { %v134_v14 = vadd.f32 %v154_v12, %v133_v13  ;;  %v175_v15 = vpop.f32.mrb[1].mxu0 }
 0x15f   :  { %138 = vst.msk [vmem:[#allocation5] sm:$0x3] %vm137_vm4, %v134_v14 }
 0x160   :  { %225 = shalt.err (!%p222_p12)
}
 0x161   :  { %s226_s12 = scalar_lea.hbm %s313_s4, 32 }
 0x162   :  { %p227_p13 = scmp.ne.s32.totalorder %s313_s4, %s226_s12  ;;  %p230_p0 = scmp.lt.u32.totalorder %s226_s12, %s313_s4 }
 0x164   :  { %p232_p1 = pnand %p230_p0, %p227_p13 }
 0x166   :  { %235 = shalt.err (!%p232_p1)
}
 0x167   :  { %148 = dma.vmem_to_hbm [thread:$0]  %s146_s9, 32, %s313_s4, [#allocation4]  }
 0x168   :  { %238 = dma.done.wait [#allocation4], 32  }
 0x169   :  { %239 = vsyncadd [#allocation4], 4294967264 }
 0x16a   :  { %152 = vsyncpa [#allocation3], 1 }
 0x16b   :  { %153 = vsyncpa [#allocation4], 1 }

</bundles_post_ra>
